<compile_context>
chip_gen: v6e
topology: v6e:2x2x1
jax: 0.10.0
libtpu: 0.0.40
codegen_flags: <defaults>
</compile_context>

<pallas_src>
import functools

import jax
import jax.numpy as jnp
from jax import lax
from jax.experimental import pallas as pl
from jax.experimental.pallas import tpu as pltpu

LANE = 128


def _make_divisible(ch, divisor=8, min_ch=None):
    if min_ch is None:
        min_ch = divisor
    new_ch = max(min_ch, int(ch + divisor / 2) // divisor * divisor)
    if new_ch < 0.9 * ch:
        new_ch += divisor
    return new_ch


# ---------------------------- Pallas kernels ----------------------------

def _pool_se_kernel(x_ref, w1_ref, b1_ref, w2t_ref, b2_ref, s_ref, *,
                    hw, hw_tile, needs_mask):
    """Global avg-pool over spatial tiles + fused fc1/ReLU/fc2/hardsigmoid.

    Grid = (N, T).  s_ref's block index is (n, 0, 0) for every spatial tile t,
    so it stays VMEM-resident across the reduction axis and doubles as the
    pooled-sum accumulator; the tiny SE MLP runs on the last tile.
    """
    t = pl.program_id(1)

    @pl.when(t == 0)
    def _():
        s_ref[...] = jnp.zeros_like(s_ref)

    x = x_ref[...].astype(jnp.float32)                       # (1, C, HWt)
    if needs_mask:
        col = lax.broadcasted_iota(jnp.int32, x.shape, 2)
        x = jnp.where(col + t * hw_tile < hw, x, 0.0)        # zero the OOB tail
    s_ref[...] += jnp.sum(x, axis=2, keepdims=True)          # (1, C, 1)

    @pl.when(t == pl.num_programs(1) - 1)
    def _():
        pooled = s_ref[0] * (1.0 / hw)                                    # (C, 1)
        # fc1: h[j] = sum_c w1[c, j] * pooled[c] + b1[j]
        h = jnp.sum(w1_ref[...] * pooled, axis=0, keepdims=True) + b1_ref[...]   # (1, Csq)
        h = jnp.maximum(h, 0.0)                                           # ReLU
        # fc2: s2[c] = sum_j w2t[c, j] * h[j] + b2[c]
        s2 = jnp.sum(w2t_ref[...] * h, axis=1, keepdims=True) + b2_ref[...]      # (C, 1)
        s2 = jnp.clip((s2 + 3.0) * (1.0 / 6.0), 0.0, 1.0)                 # hardsigmoid
        s_ref[...] = s2[None]                                             # (1, C, 1)


def _scale_kernel(s_ref, x_ref, o_ref):
    # Broadcast the per-(batch, channel) scale across the spatial (lane) tile.
    o_ref[...] = (x_ref[...] * s_ref[...]).astype(o_ref.dtype)


# ---------------------------- wrapper ----------------------------

def se_block_forward(x_nchw, w1, b1, w2, b2):
    """seBlock forward.

    x_nchw: (N, C, H, W)
    w1: (C, Csq), b1: (Csq,)   -- fc1 (1x1 conv on the pooled vector, transposed)
    w2: (Csq, C), b2: (C,)     -- fc2
    Returns (N, C, H, W).
    """
    N, C, H, W = x_nchw.shape
    Csq = w1.shape[1]
    HW = H * W

    x = x_nchw.reshape(N, C, HW)              # free reshape; stays NCHW in HBM

    # Spatial tile (lane axis): multiple of 128, or full HW when HW < 128.
    if HW <= LANE:
        hw_tile = HW
    else:
        cap = (HW // LANE) * LANE                                   # <= HW
        target = max(LANE, ((4 * 1024 * 1024) // (4 * C)) // LANE * LANE)
        hw_tile = min(cap, target, 8192)
    T = -(-HW // hw_tile)
    needs_mask = (HW % hw_tile) != 0

    w1_cs = w1.astype(jnp.float32)                      # (C, Csq)
    b1_r = b1.astype(jnp.float32).reshape(1, Csq)       # (1, Csq)
    w2t = w2.astype(jnp.float32).T                      # (C, Csq)
    b2_c = b2.astype(jnp.float32).reshape(C, 1)         # (C, 1)

    vmem_limit = 32 * 1024 * 1024

    # Pass 1: pooled-sum reduction over spatial tiles + fused SE MLP epilogue.
    scale = pl.pallas_call(
        functools.partial(_pool_se_kernel,
                          hw=HW, hw_tile=hw_tile, needs_mask=needs_mask),
        grid=(N, T),
        in_specs=[
            pl.BlockSpec((1, C, hw_tile), lambda n, t: (n, 0, t)),
            pl.BlockSpec((C, Csq), lambda n, t: (0, 0)),
            pl.BlockSpec((1, Csq), lambda n, t: (0, 0)),
            pl.BlockSpec((C, Csq), lambda n, t: (0, 0)),
            pl.BlockSpec((C, 1), lambda n, t: (0, 0)),
        ],
        out_specs=pl.BlockSpec((1, C, 1), lambda n, t: (n, 0, 0)),
        out_shape=jax.ShapeDtypeStruct((N, C, 1), jnp.float32),
        compiler_params=pltpu.CompilerParams(
            dimension_semantics=("parallel", "arbitrary"),
            vmem_limit_bytes=vmem_limit),
    )(x, w1_cs, b1_r, w2t, b2_c)

    # Pass 2: broadcast channel-wise scale over the spatial tiles (fully parallel).
    y = pl.pallas_call(
        _scale_kernel,
        grid=(N, T),
        in_specs=[
            pl.BlockSpec((1, C, 1), lambda n, t: (n, 0, 0)),
            pl.BlockSpec((1, C, hw_tile), lambda n, t: (n, 0, t)),
        ],
        out_specs=pl.BlockSpec((1, C, hw_tile), lambda n, t: (n, 0, t)),
        out_shape=jax.ShapeDtypeStruct((N, C, HW), x_nchw.dtype),
        compiler_params=pltpu.CompilerParams(
            dimension_semantics=("parallel", "parallel"),
            vmem_limit_bytes=vmem_limit),
    )(scale, x)

    return y.reshape(N, C, H, W)


# ---------------------------- reference & main ----------------------------

def se_block_reference(x_nchw, w1, b1, w2, b2):
    """Pure-JAX reference (same math as the PyTorch seBlock.forward)."""
    x = x_nchw.astype(jnp.float32)
    pooled = jnp.mean(x, axis=(2, 3))                    # (N, C)
    s = jnp.maximum(pooled @ w1 + b1, 0.0)               # fc1 + ReLU
    s = s @ w2 + b2                                      # fc2
    s = jnp.clip((s + 3.0) / 6.0, 0.0, 1.0)              # hardsigmoid
    return x * s[:, :, None, None]


def _run_case(key, N, C, H, W):
    Csq = _make_divisible(C // 4)
    kx, k1, k2, k3, k4 = jax.random.split(key, 5)
    x = jax.random.normal(kx, (N, C, H, W), jnp.float32)
    w1 = 0.1 * jax.random.normal(k1, (C, Csq), jnp.float32)
    b1 = 0.1 * jax.random.normal(k2, (Csq,), jnp.float32)
    w2 = 0.1 * jax.random.normal(k3, (Csq, C), jnp.float32)
    b2 = 0.1 * jax.random.normal(k4, (C,), jnp.float32)

    out = jax.block_until_ready(se_block_forward(x, w1, b1, w2, b2))
    ref = se_block_reference(x, w1, b1, w2, b2)
    assert out.shape == (N, C, H, W), out.shape
    err = float(jnp.max(jnp.abs(out - ref)))
    assert jnp.allclose(out, ref, rtol=1e-4, atol=1e-4), err


if __name__ == "__main__":
    key = jax.random.PRNGKey(0)
    k0, k1 = jax.random.split(key)
    _run_case(k0, N=2, C=32, H=16, W=16)   # HW = 256, evenly tiled
    _run_case(k1, N=2, C=16, H=12, W=12)   # HW = 144, exercises the masked tail tile
    print("KERNEL_OK")
</pallas_src>

<mosaic_0001>
module attributes {stable_mosaic.version = 11 : i64} {
  func.func @_pool_se_kernel(%arg0: i32, %arg1: i32, %arg2: memref<1x32x256xf32, #tpu.memory_space<vmem>>, %arg3: memref<32x8xf32, #tpu.memory_space<vmem>>, %arg4: memref<1x8xf32, #tpu.memory_space<vmem>>, %arg5: memref<32x8xf32, #tpu.memory_space<vmem>>, %arg6: memref<32x1xf32, #tpu.memory_space<vmem>>, %arg7: memref<1x32x1xf32, #tpu.memory_space<vmem>>) attributes {dimension_semantics = [#tpu.dimension_semantics<parallel>, #tpu.dimension_semantics<arbitrary>], iteration_bounds = array<i64: 2, 1>, scalar_prefetch = 0 : i64, scratch_operands = 0 : i64, tpu.core_type = #tpu.core_type<tc>, window_params = [{transform_indices = @transform_0, window_bounds = array<i64: 1, 32, 256>}, {pipeline_mode = #tpu.pipeline_mode<synchronous>, transform_indices = @transform_1, window_bounds = array<i64: 32, 8>}, {pipeline_mode = #tpu.pipeline_mode<synchronous>, transform_indices = @transform_2, window_bounds = array<i64: 1, 8>}, {pipeline_mode = #tpu.pipeline_mode<synchronous>, transform_indices = @transform_3, window_bounds = array<i64: 32, 8>}, {pipeline_mode = #tpu.pipeline_mode<synchronous>, transform_indices = @transform_4, window_bounds = array<i64: 32, 1>}, {transform_indices = @transform_5, window_bounds = array<i64: 1, 32, 1>}]} {
    %c0_i32 = arith.constant 0 : i32
    %0 = arith.cmpi eq, %arg1, %c0_i32 : i32
    %1 = arith.extui %0 : i1 to i32
    %c0_i32_0 = arith.constant 0 : i32
    %2 = arith.cmpi ne, %1, %c0_i32_0 : i32
    scf.if %2 {
      %cst_11 = arith.constant 0.000000e+00 : f32
      %12 = vector.broadcast %cst_11 : f32 to vector<1x32x1xf32>
      %c0_12 = arith.constant 0 : index
      %c0_13 = arith.constant 0 : index
      %c0_14 = arith.constant 0 : index
      %13 = vector.load %arg7[%c0_12, %c0_13, %c0_14] : memref<1x32x1xf32, #tpu.memory_space<vmem>>, vector<1x32x1xf32>
      tpu.vector_store %arg7[%c0_12, %c0_13, %c0_14], %12 {strides = array<i32>} : memref<1x32x1xf32, #tpu.memory_space<vmem>>, vector<1x32x1xf32>,
    } else {
    }
    %c0 = arith.constant 0 : index
    %c0_1 = arith.constant 0 : index
    %c0_2 = arith.constant 0 : index
    %3 = vector.load %arg2[%c0, %c0_1, %c0_2] : memref<1x32x256xf32, #tpu.memory_space<vmem>>, vector<1x32x256xf32>
    %c0_3 = arith.constant 0 : index
    %c0_4 = arith.constant 0 : index
    %c0_5 = arith.constant 0 : index
    %4 = vector.load %arg7[%c0_3, %c0_4, %c0_5] : memref<1x32x1xf32, #tpu.memory_space<vmem>>, vector<1x32x1xf32>
    %cst = arith.constant dense<0.000000e+00> : vector<1x32xf32>
    %5 = vector.multi_reduction <add>, %3, %cst [2] : vector<1x32x256xf32> to vector<1x32xf32>
    %6 = vector.shape_cast %5 : vector<1x32xf32> to vector<1x32x1xf32>
    %7 = arith.addf %4, %6 : vector<1x32x1xf32>
    %c0_6 = arith.constant 0 : index
    %c0_7 = arith.constant 0 : index
    %c0_8 = arith.constant 0 : index
    %8 = vector.load %arg7[%c0_6, %c0_7, %c0_8] : memref<1x32x1xf32, #tpu.memory_space<vmem>>, vector<1x32x1xf32>
    tpu.vector_store %arg7[%c0_6, %c0_7, %c0_8], %7 {strides = array<i32>} : memref<1x32x1xf32, #tpu.memory_space<vmem>>, vector<1x32x1xf32>,
    %c0_i32_9 = arith.constant 0 : i32
    %9 = arith.cmpi eq, %arg1, %c0_i32_9 : i32
    %10 = arith.extui %9 : i1 to i32
    %c0_i32_10 = arith.constant 0 : i32
    %11 = arith.cmpi ne, %10, %c0_i32_10 : i32
    scf.if %11 {
      %c0_11 = arith.constant 0 : index
      %c0_12 = arith.constant 0 : index
      %c0_13 = arith.constant 0 : index
      %12 = vector.load %arg7[%c0_11, %c0_12, %c0_13] : memref<1x32x1xf32, #tpu.memory_space<vmem>>, vector<1x32x1xf32>
      %13 = vector.shape_cast %12 : vector<1x32x1xf32> to vector<32x1xf32>
      %cst_14 = arith.constant 3.906250e-03 : f32
      %14 = vector.broadcast %cst_14 : f32 to vector<32x1xf32>
      %15 = arith.mulf %13, %14 : vector<32x1xf32>
      %c0_15 = arith.constant 0 : index
      %c0_16 = arith.constant 0 : index
      %16 = vector.load %arg3[%c0_15, %c0_16] : memref<32x8xf32, #tpu.memory_space<vmem>>, vector<32x8xf32>
      %17 = vector.broadcast %15 : vector<32x1xf32> to vector<32x8xf32>
      %18 = arith.mulf %16, %17 : vector<32x8xf32>
      %cst_17 = arith.constant dense<0.000000e+00> : vector<8xf32>
      %19 = vector.multi_reduction <add>, %18, %cst_17 [0] : vector<32x8xf32> to vector<8xf32>
      %20 = vector.shape_cast %19 : vector<8xf32> to vector<1x8xf32>
      %c0_18 = arith.constant 0 : index
      %c0_19 = arith.constant 0 : index
      %21 = vector.load %arg4[%c0_18, %c0_19] : memref<1x8xf32, #tpu.memory_space<vmem>>, vector<1x8xf32>
      %22 = arith.addf %20, %21 : vector<1x8xf32>
      %cst_20 = arith.constant 0.000000e+00 : f32
      %23 = vector.broadcast %cst_20 : f32 to vector<1x8xf32>
      %24 = arith.maximumf %22, %23 : vector<1x8xf32>
      %c0_21 = arith.constant 0 : index
      %c0_22 = arith.constant 0 : index
      %25 = vector.load %arg5[%c0_21, %c0_22] : memref<32x8xf32, #tpu.memory_space<vmem>>, vector<32x8xf32>
      %26 = vector.broadcast %24 : vector<1x8xf32> to vector<32x8xf32>
      %27 = arith.mulf %25, %26 : vector<32x8xf32>
      %cst_23 = arith.constant dense<0.000000e+00> : vector<32xf32>
      %28 = vector.multi_reduction <add>, %27, %cst_23 [1] : vector<32x8xf32> to vector<32xf32>
      %29 = vector.shape_cast %28 : vector<32xf32> to vector<32x1xf32>
      %c0_24 = arith.constant 0 : index
      %c0_25 = arith.constant 0 : index
      %30 = vector.load %arg6[%c0_24, %c0_25] : memref<32x1xf32, #tpu.memory_space<vmem>>, vector<32x1xf32>
      %31 = arith.addf %29, %30 : vector<32x1xf32>
      %cst_26 = arith.constant 3.000000e+00 : f32
      %32 = vector.broadcast %cst_26 : f32 to vector<32x1xf32>
      %33 = arith.addf %31, %32 : vector<32x1xf32>
      %cst_27 = arith.constant 0.166666672 : f32
      %34 = vector.broadcast %cst_27 : f32 to vector<32x1xf32>
      %35 = arith.mulf %33, %34 : vector<32x1xf32>
      %cst_28 = arith.constant 0.000000e+00 : f32
      %cst_29 = arith.constant 1.000000e+00 : f32
      %36 = vector.broadcast %cst_28 : f32 to vector<32x1xf32>
      %37 = arith.maximumf %36, %35 : vector<32x1xf32>
      %38 = vector.broadcast %cst_29 : f32 to vector<32x1xf32>
      %39 = arith.minimumf %38, %37 : vector<32x1xf32>
      %40 = vector.shape_cast %39 : vector<32x1xf32> to vector<1x32x1xf32>
      %c0_30 = arith.constant 0 : index
      %c0_31 = arith.constant 0 : index
      %c0_32 = arith.constant 0 : index
      %41 = vector.load %arg7[%c0_30, %c0_31, %c0_32] : memref<1x32x1xf32, #tpu.memory_space<vmem>>, vector<1x32x1xf32>
      tpu.vector_store %arg7[%c0_30, %c0_31, %c0_32], %40 {strides = array<i32>} : memref<1x32x1xf32, #tpu.memory_space<vmem>>, vector<1x32x1xf32>,
    } else {
    }
    return
  }
  func.func @transform_0(%arg0: i32, %arg1: i32) -> (i32, i32, i32) {
    %c0_i32 = arith.constant 0 : i32
    %c0_i32_0 = arith.constant 0 : i32
    return %arg0, %c0_i32, %arg1 : i32, i32, i32
  }
  func.func @transform_1(%arg0: i32, %arg1: i32) -> (i32, i32) {
    %c0_i32 = arith.constant 0 : i32
    %c0_i32_0 = arith.constant 0 : i32
    %c0_i32_1 = arith.constant 0 : i32
    return %c0_i32, %c0_i32_0 : i32, i32
  }
  func.func @transform_2(%arg0: i32, %arg1: i32) -> (i32, i32) {
    %c0_i32 = arith.constant 0 : i32
    %c0_i32_0 = arith.constant 0 : i32
    %c0_i32_1 = arith.constant 0 : i32
    return %c0_i32, %c0_i32_0 : i32, i32
  }
  func.func @transform_3(%arg0: i32, %arg1: i32) -> (i32, i32) {
    %c0_i32 = arith.constant 0 : i32
    %c0_i32_0 = arith.constant 0 : i32
    %c0_i32_1 = arith.constant 0 : i32
    return %c0_i32, %c0_i32_0 : i32, i32
  }
  func.func @transform_4(%arg0: i32, %arg1: i32) -> (i32, i32) {
    %c0_i32 = arith.constant 0 : i32
    %c0_i32_0 = arith.constant 0 : i32
    %c0_i32_1 = arith.constant 0 : i32
    return %c0_i32, %c0_i32_0 : i32, i32
  }
  func.func @transform_5(%arg0: i32, %arg1: i32) -> (i32, i32, i32) {
    %c0_i32 = arith.constant 0 : i32
    %c0_i32_0 = arith.constant 0 : i32
    %c0_i32_1 = arith.constant 0 : i32
    return %arg0, %c0_i32, %c0_i32_0 : i32, i32, i32
  }
}

</mosaic_0001>

<bundles_post_ra>
// kernel: tpu_custom_call.1
= control target key start
LH: loop header
LB: loop body
LE: loop exit
PB: predicated region body
PF: predicated region fallthrough
CT: control target
= control target key end

     0   :  { %10 = vsyncpa [#allocation3], 0  ;;  %s858_s0 = inlined_call_operand.hbm [shape: f32[2,32,256], index: 0, kind: input, shape index: {}]   ;;  %s859_s1 = inlined_call_operand.vmem [shape: f32[32,8], index: 1, kind: input, shape index: {}]   ;;  %s860_s2 = inlined_call_operand.vmem [shape: f32[1,8], index: 2, kind: input, shape index: {}]   ;;  %s861_s3 = inlined_call_operand.vmem [shape: f32[32,8], index: 3, kind: input, shape index: {}]   ;;  %s862_s4 = inlined_call_operand.vmem [shape: f32[32,1], index: 4, kind: input, shape index: {}]   ;;  %s863_s5 = inlined_call_operand.vmem [shape: f32[2,32,1], index: 5, kind: output, shape index: {}]  }
   0x1   :  { %12 = vsyncpa [#allocation3 + $0x1], 0  ;;  %s681_s18 = smov 0   ;;  %s683_s19 = smov 0  }
   0x2   :  { %s685_s20 = smov 0   ;;  %s687_s21 = smov 0  }
   0x3   :  { %s689_s22 = smov 0   ;;  %s691_s23 = smov 0  }
   0x4 LB: > { %s490_s24 = sadd.s32 4294967295, %s644_s23   ;;  %s30_s25 = sadd.s32 1, %s640_s22  ;;  %s644_s23 = sphi %s691_s23, %s18_s23   ;;  %s640_s22 = sphi %s689_s22, %s871_s22   ;;  %s636_s21 = sphi %s687_s21, %s870_s21   ;;  %s632_s20 = sphi %s685_s20, %s869_s20   ;;  %s628_s19 = sphi %s683_s19, %s868_s19   ;;  %s624_s18 = sphi %s681_s18, %s867_s18  }
   0x5   : > { %p32_p0 = scmp.ge.s32.totalorder %s30_s25, 2  ;;  %s39_s26 = sadd.s32 1, %s632_s20 }
   0x6   : > { %p46_p1 = scmp.ne.s32.totalorder %s632_s20, %s628_s19  ;;  %p47_p2 = scmp.eq.s32.totalorder %s644_s23, 0 }
   0x7   : > { %s873_s25 = smov (%p32_p0, %s30_s25), 0  ;;  %p52_p4 = scmp.ne.s32.totalorder %s628_s19, %s624_s18 }
   0x8   : > { %p717_p3 = por %p47_p2, %p46_p1  ;;  %s34_s28 = ssub.s32 %s640_s22, %s873_s25 }
   0x9   : > { %p53_p5 = scmp.eq.s32.totalorder %s490_s24, 0  ;;  %p37_p6 = scmp.eq.s32.totalorder %s34_s28, 0 }
   0xa   : > { %p511_p8 = scmp.lt.s32.totalorder %s644_s23, 2  ;;  %s198_s6 = sand.u32 1, %s632_s20  }
   0xb   : > { %p724_p7 = por %p53_p5, %p52_p4  ;;  %s503_s7 = sshll.u32 %s640_s22, 10 }
   0xc   : > { %s730_s30 = scalar_select %p37_p6, %s632_s20, %s39_s26  }
   0xd   : > { %s494_s8 = sshll.u32 %s198_s6, 6  ;;  %s210_s11 = scalar_lea.hbm %s858_s0, %s503_s7 }
   0xe   : > { %s202_s12 = scalar_lea.vmem [#allocation2], %s494_s8  ;;  %p739_p9 = pnand %p511_p8, %p717_p3 }
   0xf   : > { %s211_s13 = sshll.u32 %s202_s12, 4  ;;  %s199_s15 = scalar_lea.sflag [#allocation3], %s198_s6  ;;  %s212_s13 = int_to_ptr.vmem [resolvable:$true] %s211_s13 }
  0x10   : > { %p568_p10 = pneg %p739_p9  ;;  %s579_s16 = scalar_lea.vmem %s212_s13, 1024 }
  0x11   : > { %p580_p11 = scmp.ne.s32.totalorder %s212_s13, %s579_s16  ;;  %s646_s17 = smov [#allocation2]  }
  0x12   : > { %s584_s18 = sshll.u32 %s646_s17, 4  ;;  %s585_s18 = int_to_ptr.vmem [resolvable:$false] %s584_s18 }
  0x13   : > { %p582_p12 = pnand %p580_p11, %p568_p10  ;;  %s586_s24 = scalar_lea.vmem %s585_s18, 2048 }
  0x14   : > { %p587_p0 = scmp.lt.s32.totalorder %s212_s13, %s585_s18  ;;  %p588_p1 = scmp.lt.s32.totalorder %s586_s24, %s579_s16 }
  0x15   : > { %p583_p13 = pneg %p582_p12 }
  0x16   : > { %p589_p2 = por %p588_p1, %p587_p0 }
  0x18   : > { %p590_p3 = pnand %p589_p2, %p583_p13 }
  0x1a   : > { %593 = shalt.err (!%p590_p3)
}
  0x1b   : > { %s647_s26 = smov 256   ;;  %s648_s27 = smov 16  }
  0x1c   : > { %510 = dma.hbm_to_vmem [thread:$0]  (!%p739_p9), %s210_s11, 1024, %s212_s13, %s199_s15, %s647_s26, %s647_s26, %s648_s27  }
  0x1d   : > { %p497_p4 = scmp.ge.s32.totalorder %s644_s23, 1  ;;  %p219_p5 = scmp.lt.s32.totalorder %s644_s23, 3 }
  0x1f   : > { %p220_p6 = pnand %p497_p4, %p219_p5 }
  0x20   : > { %s225_s28 = sand.u32 (!%p220_p6), 1, %s628_s19  }
  0x21   : > { %223 = sbr.rel (%p220_p6) target bundleno = 511 (0x1ff), region = 40  ;;  %s498_s6 = sshll.u32 (!%p220_p6), %s225_s28, 6 }
  0x22   : > { %s226_s7 = scalar_lea.sflag (!%p220_p6), [#allocation3], %s225_s28  ;;  %s229_s8 = scalar_lea.vmem (!%p220_p6), [#allocation2], %s498_s6 }
  0x26   : > { %619 = dma.done.wait (%p724_p7), %s226_s7, 1024  }
  0x27   : > { %621 = vsyncadd (%p724_p7), %s226_s7, 4294966272  ;;  %p257_p8 = scmp.lt.s32.totalorder %s636_s21, 1  ;;  %vm266_vm0 = vcmask 7168   ;;  %v649_v0 = vmov 0.0   ;;  %v271_v1 = vld [vmem:[%s229_s8] sm:$0xff]  ;;  %v272_v2 = vld [vmem:[%s229_s8 + $0x8] sm:$0xff]  ;;  %v364_v56 = vlaneseq }
  0x28   : > { %v273_v3 = vld [vmem:[%s229_s8 + $0x10] sm:$0xff]  ;;  %v283_v4 = vadd.f32 %v272_v2, %v271_v1  ;;  %v274_v5 = vld [vmem:[%s229_s8 + $0x18] sm:$0xff]  ;;  %v275_v6 = vld [vmem:[%s229_s8 + $0x20] sm:$0xff]  ;;  %v650_v13 = vmov 0   ;;  %vm343_vm1 = vcmask 64512  }
  0x29   : > { %s875_s21 = smov (!%p257_p8, %s636_s21), 1  ;;  %v276_v7 = vld [vmem:[%s229_s8 + $0x28] sm:$0xff]  ;;  %v277_v9 = vld [vmem:[%s229_s8 + $0x30] sm:$0xff]  ;;  %v278_v10 = vld [vmem:[%s229_s8 + $0x38] sm:$0xff]  ;;  %v286_v11 = vadd.f32 %v274_v5, %v273_v3  ;;  %564 = vset.pattern.permute.xlu0 %v650_v13  ;;  %565 = vset.pattern.permute.xlu1 %v650_v13  ;;  %v365_v59 = vshrl.u32 %v364_v56, 7 }
  0x2a   : > { %s504_s9 = sshll.u32 %s875_s21, 5  ;;  %v289_v8 = vadd.f32 %v276_v7, %v275_v6  ;;  %284 = vadd.xlane.f32.xlu0 %v283_v4  ;;  %v292_v12 = vadd.f32 %v278_v10, %v277_v9  ;;  %v316_v34 = vld [vmem:[%s859_s1 + $0x8] sm:$0xff]  ;;  %v315_v35 = vld [vmem:[%s859_s1] sm:$0xff]  ;;  %v317_v39 = vld [vmem:[%s859_s1 + $0x10] sm:$0xff] }
  0x2b   : > { %s759_s12 = scalar_lea.vmem %s863_s5, %s504_s9  ;;  %v318_v44 = vld [vmem:[%s859_s1 + $0x18] sm:$0xff]  ;;  %v357_v60 = vld [vmem:[%s860_s2] sm:$0x1]  ;;  %v366_v63 = vsub.s32 0, %v365_v59  ;;  %v361_v1 = vld [vmem:[%s861_s3 + $0x8] sm:$0xff] }
  0x2c   : > { %267 = vst.msk [vmem:[%s759_s12] sm:$0xff] %vm266_vm0, %v649_v0  ;;  %268 = vst.msk [vmem:[%s759_s12 + $0x8] sm:$0xff] %vm266_vm0, %v649_v0  ;;  %290 = vadd.xlane.f32.xlu1 %v289_v8  ;;  %v360_v2 = vld [vmem:[%s861_s3] sm:$0xff]  ;;  %v362_v4 = vld [vmem:[%s861_s3 + $0x10] sm:$0xff] }
  0x2d   : > { %269 = vst.msk [vmem:[%s759_s12 + $0x10] sm:$0xff] %vm266_vm0, %v649_v0  ;;  %270 = vst.msk [vmem:[%s759_s12 + $0x18] sm:$0xff] %vm266_vm0, %v649_v0  ;;  %v363_v10 = vld [vmem:[%s861_s3 + $0x18] sm:$0xff] }
  0x2e   : > { %287 = vadd.xlane.f32.xlu0 %v286_v11 }
  0x30   : > { %293 = vadd.xlane.f32.xlu1 %v292_v12 }
  0x33   : > { %v279_v14 = vld [vmem:[%s759_s12] sm:$0xff]  ;;  %v280_v19 = vld [vmem:[%s759_s12 + $0x8] sm:$0xff] }
  0x34   : > { %v281_v15 = vld [vmem:[%s759_s12 + $0x10] sm:$0xff]  ;;  %v282_v21 = vld [vmem:[%s759_s12 + $0x18] sm:$0xff] }
  0xb3   : > { %v285_v16 = vpop.xlane.xlu0 %284 }
  0xb4   : > { %v295_v17 = vadd.f32 %v285_v16, %v279_v14  ;;  %v385_v14 = vld [vmem:[%s862_s4 + $0x8] sm:$0xff] }
  0xb5   : > { %v291_v18 = vpop.xlane.xlu1 %290 }
  0xb6   : > { %v297_v20 = vadd.f32 %v291_v18, %v281_v15  ;;  %300 = vst.msk [vmem:[%s759_s12] sm:$0xff] %vm266_vm0, %v295_v17  ;;  %v384_v15 = vld [vmem:[%s862_s4] sm:$0xff] }
  0xb7   : > { %v288_v22 = vpop.xlane.xlu0 %287 }
  0xb8   : > { %302 = vst.msk [vmem:[%s759_s12 + $0x10] sm:$0xff] %vm266_vm0, %v297_v20  ;;  %v296_v23 = vadd.f32 %v288_v22, %v280_v19  ;;  %v386_v20 = vld [vmem:[%s862_s4 + $0x10] sm:$0xff] }
  0xb9   : > { %v294_v24 = vpop.xlane.xlu1 %293 }
  0xba   : > { %v298_v25 = vadd.f32 %v294_v24, %v282_v21  ;;  %301 = vst.msk [vmem:[%s759_s12 + $0x8] sm:$0xff] %vm266_vm0, %v296_v23 }
  0xbc   : > { %303 = vst.msk [vmem:[%s759_s12 + $0x18] sm:$0xff] %vm266_vm0, %v298_v25 }
  0xbd   : > { %v307_v26 = vld [vmem:[%s759_s12] sm:$0xff] }
  0xbe   : > { %v311_v27 = vmul.f32 0.00390625, %v307_v26 }
  0xbf   : > { %v309_v29 = vld [vmem:[%s759_s12 + $0x10] sm:$0xff] }
  0xc0   : > { %321 = vperm.xlu0 %564, %v311_v27   ;;  %v313_v31 = vmul.f32 0.00390625, %v309_v29  ;;  %v387_v27 = vld [vmem:[%s862_s4 + $0x18] sm:$0xff] }
  0xc1   : > { %v308_v28 = vld [vmem:[%s759_s12 + $0x8] sm:$0xff] }
  0xc2   : > { %v312_v30 = vmul.f32 0.00390625, %v308_v28 }
  0xc3   : > { %v310_v32 = vld [vmem:[%s759_s12 + $0x18] sm:$0xff] }
  0xc4   : > { %326 = vperm.xlu1 %565, %v312_v30   ;;  %v314_v33 = vmul.f32 0.00390625, %v310_v32 }
  0xc8   : > { %331 = vperm.xlu1 %565, %v313_v31  }
  0xcc   : > { %336 = vperm.xlu1 %565, %v314_v33  }
 0x13b   : > { %v322_v36 = vpop.permute.xlu0 %321 }
 0x13c   : > { %v339_v40 = vmul.f32 %v322_v36, %v315_v35 }
 0x13e   : > { %v344_v45 = vsel %vm343_vm1, %v339_v40, 0.0 }
 0x13f   : > { %v327_v37 = vpop.permute.xlu1 %326 }
 0x140   : > { %v340_v38 = vmul.f32 %v327_v37, %v316_v34 }
 0x142   : > { %v345_v42 = vsel %vm343_vm1, %v340_v38, 0.0 }
 0x143   : > { %v332_v41 = vpop.permute.xlu1 %331  ;;  %v346_v47 = vadd.f32 %v345_v42, %v344_v45 }
 0x144   : > { %v341_v43 = vmul.f32 %v332_v41, %v317_v39 }
 0x146   : > { %v347_v46 = vsel %vm343_vm1, %v341_v43, 0.0 }
 0x147   : > { %v337_v48 = vpop.permute.xlu1 %336  ;;  %v348_v50 = vadd.f32 %v347_v46, %v346_v47 }
 0x148   : > { %v342_v49 = vmul.f32 %v337_v48, %v318_v44 }
 0x14a   : > { %v349_v51 = vsel %vm343_vm1, %v342_v49, 0.0 }
 0x14b   : > { %v350_v52 = vadd.f32 %v349_v51, %v348_v50 }
 0x14d   : > { %v351_v53 = vrot.slane %v350_v52, 4 }
 0x14f   : > { %v352_v54 = vadd.f32 %v351_v53, %v350_v52 }
 0x151   : > { %v353_v55 = vrot.slane %v352_v54, 2 }
 0x153   : > { %v354_v57 = vadd.f32 %v353_v55, %v352_v54 }
 0x155   : > { %v355_v58 = vrot.slane %v354_v57, 1 }
 0x157   : > { %v356_v61 = vadd.f32 %v355_v58, %v354_v57 }
 0x159   : > { %v358_v62 = vadd.f32 %v357_v60, %v356_v61 }
 0x15b   : > { %v359_v0 = vmax.f32 %v358_v62, 0.0 }
 0x15d   : > { %v367_v3 = vrot.slane %v359_v0, %v366_v63 }
 0x15f   : > { %v369_v5 = vmul.f32 %v367_v3, %v361_v1  ;;  %v368_v6 = vmul.f32 %v367_v3, %v360_v2  ;;  %v370_v9 = vmul.f32 %v367_v3, %v362_v4  ;;  %v371_v12 = vmul.f32 %v367_v3, %v363_v10 }
 0x161   : > { %v375_v7 = vsel %vm343_vm1, %v369_v5, 0.0  ;;  %v372_v8 = vsel %vm343_vm1, %v368_v6, 0.0  ;;  %v378_v11 = vsel %vm343_vm1, %v370_v9, 0.0  ;;  %v381_v13 = vsel %vm343_vm1, %v371_v12, 0.0 }
 0x162   : > { %376 = vadd.xlane.f32.xlu0 %v375_v7  ;;  %373 = vadd.xlane.f32.xlu1 %v372_v8 }
 0x166   : > { %379 = vadd.xlane.f32.xlu1 %v378_v11 }
 0x16a   : > { %382 = vadd.xlane.f32.xlu1 %v381_v13 }
 0x1eb   : > { %v377_v16 = vpop.xlane.xlu0 %376  ;;  %v374_v17 = vpop.xlane.xlu1 %373 }
 0x1ec   : > { %v389_v18 = vadd.f32 %v385_v14, %v377_v16  ;;  %v388_v19 = vadd.f32 %v384_v15, %v374_v17 }
 0x1ee   : > { %v393_v21 = vadd.f32 3.0, %v389_v18  ;;  %v392_v22 = vadd.f32 3.0, %v388_v19 }
 0x1ef   : > { %v380_v23 = vpop.xlane.xlu1 %379 }
 0x1f0   : > { %v397_v24 = vmul.f32 0.16666667, %v393_v21  ;;  %v396_v25 = vmul.f32 0.16666667, %v392_v22  ;;  %v390_v26 = vadd.f32 %v386_v20, %v380_v23 }
 0x1f2   : > { %v401_v28 = vmax.f32 %v397_v24, 0.0  ;;  %v400_v29 = vmax.f32 %v396_v25, 0.0  ;;  %v394_v30 = vadd.f32 3.0, %v390_v26 }
 0x1f3   : > { %v383_v31 = vpop.xlane.xlu1 %382 }
 0x1f4   : > { %v405_v32 = vmin.f32 %v401_v28, 1.0  ;;  %v404_v33 = vmin.f32 %v400_v29, 1.0  ;;  %v398_v34 = vmul.f32 0.16666667, %v394_v30  ;;  %v391_v35 = vadd.f32 %v387_v27, %v383_v31 }
 0x1f6   : > { %409 = vst.msk [vmem:[%s759_s12 + $0x8] sm:$0xff] %vm266_vm0, %v405_v32  ;;  %408 = vst.msk [vmem:[%s759_s12] sm:$0xff] %vm266_vm0, %v404_v33  ;;  %v402_v36 = vmax.f32 %v398_v34, 0.0  ;;  %v395_v37 = vadd.f32 3.0, %v391_v35 }
 0x1f8   : > { %v406_v38 = vmin.f32 %v402_v36, 1.0  ;;  %v399_v39 = vmul.f32 0.16666667, %v395_v37 }
 0x1fa   : > { %410 = vst.msk [vmem:[%s759_s12 + $0x10] sm:$0xff] %vm266_vm0, %v406_v38  ;;  %v403_v40 = vmax.f32 %v399_v39, 0.0 }
 0x1fc   : > { %v407_v41 = vmin.f32 %v403_v40, 1.0 }
 0x1fe   : > { %411 = vst.msk [vmem:[%s759_s12 + $0x18] sm:$0xff] %vm266_vm0, %v407_v41 }
 0x1ff PF: > { %s18_s23 = sadd.s32 1, %s644_s23   ;;  %s867_s18 = smov %s628_s19 }
 0x200   : > { %p15_p7 = scmp.ge.s32.totalorder %s18_s23, 4   ;;  %s868_s19 = smov %s632_s20 }
 0x201   : > { %s869_s20 = smov %s730_s30  ;;  %s870_s21 = smov %s640_s22 }
 0x202   : > { %s871_s22 = smov %s873_s25  ;;  %17 = sbr.rel (!%p15_p7) target bundleno = 4 (0x4), region = 88 }
 0x207   :  { %433 = vsyncpa [#allocation3], 1 }
 0x208   :  { %435 = vsyncpa [#allocation3 + $0x1], 1 }

</bundles_post_ra>
